<compile_context>
chip_gen: v7x
topology: tpu7x:2x2x1
jax: 0.10.0
libtpu: 0.0.40
codegen_flags: <defaults>
</compile_context>

<pallas_src>
from functools import partial

import jax
import jax.numpy as jnp
import numpy as np
from jax.experimental import pallas as pl
from jax.experimental.pallas import tpu as pltpu

BN_EPS = 1e-5


def _round_up(x, m):
    return ((x + m - 1) // m) * m


def _vmem_capacity_bytes():
    try:
        return int(pltpu.get_tpu_info().vmem_capacity_bytes)
    except Exception:
        return 64 << 20          # v7x-safe fallback


# --------------------------------------------------------------------------
# Fused kernel: pad -> conv3x3(+BN+ReLU) -> compact -> avgpool -> 1x1 conv
# (+BN) -> sigmoid -> feat * atten.   One grid step == one batch element.
# --------------------------------------------------------------------------
def _senet_kernel(x_ref, w9_ref, sh1_ref, watt_ref, sh2_ref, out_ref,
                  xp_ref, cf_ref, *, H, W, Wp, n2, inv_hw):
    """Per grid step (one batch element):
      x_ref    : (1, C, H*W)      unpadded image, spatial flattened on lanes
      w9_ref   : (Cout, 9*Cpad)   conv weight, BN scale folded, [o, k*Cpad+c]
      sh1_ref  : (Cout, 1)        folded conv-bias + BN shift (f32)
      watt_ref : (Cout, Cout)     conv_atten weight, bn_atten scale folded (f32)
      sh2_ref  : (Cout, 1)        bn_atten shift (f32)
      out_ref  : (1, Cout, H*W)   feat * atten, valid pixels only
      xp_ref   : (Cpad, Rp)       VMEM scratch: zero-padded image (compute dtype)
      cf_ref   : (Cout, HW2)      VMEM scratch: compacted feat (f32)
    """
    C = x_ref.shape[1]
    Cout = out_ref.shape[1]
    HW = H * W
    cdt = xp_ref.dtype

    # --- in-kernel zero padding (no wrapper pad pass over HBM) ---------------
    xp_ref[...] = jnp.zeros(xp_ref.shape, cdt)
    for h in range(H):
        dst = (h + 1) * Wp + 1
        xp_ref[0:C, dst:dst + W] = x_ref[0, :, h * W:(h + 1) * W].astype(cdt)

    # --- 3x3 conv: ONE MXU dot, K = 9*Cpad (im2col of 9 shifted windows) -----
    taps = []
    for kh in range(3):
        for kw in range(3):
            k0 = kh * Wp + kw
            taps.append(xp_ref[:, k0:k0 + n2])           # (Cpad, n2)
    xs9 = jnp.concatenate(taps, axis=0)                  # (9*Cpad, n2)
    acc = jnp.dot(w9_ref[...], xs9,
                  preferred_element_type=jnp.float32)    # (Cout, n2), f32 acc

    # --- folded BatchNorm shift + ReLU ---------------------------------------
    feat = jnp.maximum(acc + sh1_ref[...], 0.0)          # (Cout, n2)

    # --- compact valid pixels (drop the 2 junk columns per padded row) -------
    if cf_ref.shape[1] > HW:                             # zero the pooled tail
        cf_ref[:, HW:cf_ref.shape[1]] = jnp.zeros(
            (Cout, cf_ref.shape[1] - HW), jnp.float32)
    for h in range(H):
        cf_ref[:, h * W:(h + 1) * W] = feat[:, h * Wp:h * Wp + W]

    # --- global avg pool (XLU lane reduce) -> tiny matvec -> sigmoid ---------
    pooled = jnp.sum(cf_ref[...], axis=1, keepdims=True) * inv_hw   # (Cout, 1)
    z = jnp.dot(watt_ref[...], pooled,
                preferred_element_type=jnp.float32)                 # (Cout, 1)
    att = jax.nn.sigmoid(z + sh2_ref[...])                          # (Cout, 1)

    # --- out = feat * atten (lane-dense, valid pixels only) ------------------
    out_ref[0] = (cf_ref[:, 0:HW] * att).astype(out_ref.dtype)


# --------------------------------------------------------------------------
# Wrapper
# --------------------------------------------------------------------------
def senet_forward(x_nchw, params, *, compute_dtype=jnp.float32,
                  out_dtype=jnp.float32):
    B, C, H, W = x_nchw.shape
    Cout = params["w9"].shape[1]
    Wp, Hp = W + 2, H + 2
    HW = H * W
    Cpad = _round_up(C, 8)                 # 8-sublane-aligned im2col blocks
    n2 = H * Wp                            # conv output extent, padded-flat coords
    Rp = _round_up(Hp * Wp + 2, 128)       # padded-scratch width (covers last tap)
    HW2 = _round_up(HW, 128)

    # Fold inference-mode BN scales into the (tiny) weights, once, in the wrapper.
    w9 = params["w9"] * params["sc1"][None, :, :]                    # (9, Cout, C)
    w9 = jnp.pad(w9, ((0, 0), (0, 0), (0, Cpad - C)))                # (9, Cout, Cpad)
    w9f = jnp.transpose(w9, (1, 0, 2)).reshape(Cout, 9 * Cpad)       # [o, k*Cpad+c]
    w9f = w9f.astype(compute_dtype)
    watt_f = (params["watt"] * params["sc2"]).astype(jnp.float32)    # (Cout, Cout)
    sh1 = params["sh1"].astype(jnp.float32)
    sh2 = params["sh2"].astype(jnp.float32)

    x_flat = x_nchw.reshape(B, C, HW)      # free reshape; padding is in-kernel

    itm_x = jnp.dtype(x_nchw.dtype).itemsize
    itm_c = jnp.dtype(compute_dtype).itemsize
    itm_o = jnp.dtype(out_dtype).itemsize

    # VMEM budget: double-buffered in/out/weight blocks + scratches + live values.
    blk_in = C * HW * itm_x
    blk_out = Cout * HW * itm_o
    wbytes = Cout * 9 * Cpad * itm_c + (Cout * Cout + 2 * Cout) * 4
    scratch = Cpad * Rp * itm_c + Cout * HW2 * 4
    live = 9 * Cpad * n2 * itm_c + 3 * Cout * n2 * 4
    need = 2 * (blk_in + blk_out + wbytes) + scratch + live + (2 << 20)
    cap = _vmem_capacity_bytes()           # 64 MiB v7x, 128 MiB v5e/v6e
    vmem_limit = int(min(max(need, 16 << 20), int(cap * 0.85)))
    # TODO(synk): if `need` exceeds the per-core cap (large H*W / C, esp. on
    # v7x), spatial tiling is required rather than clamping.

    flops = B * (2 * 9 * Cpad * Cout * n2 + 2 * Cout * Cout + 6 * Cout * HW)
    bytes_acc = int(B * C * HW * itm_x + B * Cout * HW * itm_o
                    + Cout * 9 * Cpad * itm_c + (Cout * Cout + 2 * Cout) * 4)
    cost = pl.CostEstimate(flops=int(flops), transcendentals=int(B * Cout),
                           bytes_accessed=bytes_acc)

    kernel = partial(_senet_kernel, H=H, W=W, Wp=Wp, n2=n2, inv_hw=1.0 / HW)

    out_flat = pl.pallas_call(
        kernel,
        out_shape=jax.ShapeDtypeStruct((B, Cout, HW), out_dtype),
        grid=(B,),
        in_specs=[
            pl.BlockSpec((1, C, HW), lambda b: (b, 0, 0)),
            pl.BlockSpec((Cout, 9 * Cpad), lambda b: (0, 0)),
            pl.BlockSpec((Cout, 1), lambda b: (0, 0)),
            pl.BlockSpec((Cout, Cout), lambda b: (0, 0)),
            pl.BlockSpec((Cout, 1), lambda b: (0, 0)),
        ],
        out_specs=pl.BlockSpec((1, Cout, HW), lambda b: (b, 0, 0)),
        scratch_shapes=[
            pltpu.VMEM((Cpad, Rp), compute_dtype),
            pltpu.VMEM((Cout, HW2), jnp.float32),
        ],
        compiler_params=pltpu.CompilerParams(
            dimension_semantics=("parallel",),
            vmem_limit_bytes=vmem_limit),
        cost_estimate=cost,
    )(x_flat, w9f, sh1, watt_f, sh2)

    return out_flat.reshape(B, Cout, H, W)   # free reshape, no junk columns


# --------------------------------------------------------------------------
# Deterministic parameter init + inference-mode BN folding
# --------------------------------------------------------------------------
def make_params(key, in_chan, out_chan):
    ks = jax.random.split(key, 11)
    C, Co = in_chan, out_chan

    # conv: 3x3, C -> Co, bias=True, then BatchNorm2d + ReLU.
    w9 = jax.random.normal(ks[0], (9, Co, C), jnp.float32) * 0.2  # [kh*3+kw, co, ci]
    b1 = jax.random.normal(ks[1], (Co,), jnp.float32) * 0.1
    g1 = 1.0 + 0.1 * jax.random.normal(ks[2], (Co,), jnp.float32)
    be1 = 0.1 * jax.random.normal(ks[3], (Co,), jnp.float32)
    m1 = 0.1 * jax.random.normal(ks[4], (Co,), jnp.float32)
    v1 = jax.random.uniform(ks[5], (Co,), jnp.float32, 0.5, 1.5)
    sc1 = g1 / jnp.sqrt(v1 + BN_EPS)
    sh1 = (b1 - m1) * sc1 + be1

    # conv_atten: 1x1, Co -> Co, bias=False, then bn_atten + sigmoid.
    watt = jax.random.normal(ks[6], (Co, Co), jnp.float32) * 0.2  # watt[o, i]
    g2 = 1.0 + 0.1 * jax.random.normal(ks[7], (Co,), jnp.float32)
    be2 = 0.1 * jax.random.normal(ks[8], (Co,), jnp.float32)
    m2 = 0.1 * jax.random.normal(ks[9], (Co,), jnp.float32)
    v2 = jax.random.uniform(ks[10], (Co,), jnp.float32, 0.5, 1.5)
    sc2 = g2 / jnp.sqrt(v2 + BN_EPS)
    sh2 = be2 - m2 * sc2

    return dict(w9=w9,
                sc1=sc1.reshape(Co, 1), sh1=sh1.reshape(Co, 1),
                watt=watt,
                sc2=sc2.reshape(Co, 1), sh2=sh2.reshape(Co, 1))


# --------------------------------------------------------------------------
# Pure-JAX reference (mirrors the PyTorch forward, inference-mode BN)
# --------------------------------------------------------------------------
def reference(x_nchw, p):
    Co, C = p["w9"].shape[1], p["w9"].shape[2]
    w_oihw = jnp.transpose(p["w9"].reshape(3, 3, Co, C), (2, 3, 0, 1))
    feat = jax.lax.conv_general_dilated(
        x_nchw, w_oihw, window_strides=(1, 1), padding=((1, 1), (1, 1)),
        dimension_numbers=("NCHW", "OIHW", "NCHW"),
        precision=jax.lax.Precision.HIGHEST)
    sc1, sh1 = p["sc1"][:, 0], p["sh1"][:, 0]
    feat = jnp.maximum(feat * sc1[None, :, None, None]
                       + sh1[None, :, None, None], 0.0)
    avg = jnp.mean(feat, axis=(2, 3))                                 # (B, Co)
    z = jnp.einsum("oi,bi->bo", p["watt"], avg,
                   precision=jax.lax.Precision.HIGHEST)
    sc2, sh2 = p["sc2"][:, 0], p["sh2"][:, 0]
    att = jax.nn.sigmoid(z * sc2[None, :] + sh2[None, :])
    return feat * att[:, :, None, None]


if __name__ == "__main__":
    B, C, H, W = 2, 4, 16, 16
    Cout = 8

    key = jax.random.PRNGKey(0)
    kx, kp = jax.random.split(key)
    x = jax.random.normal(kx, (B, C, H, W), jnp.float32)
    params = make_params(kp, C, Cout)

    # f32 path (exactness check against the pure-JAX reference).
    out = jax.block_until_ready(senet_forward(x, params))
    ref = reference(x, params)
    np.testing.assert_allclose(np.asarray(out), np.asarray(ref),
                               rtol=1e-5, atol=1e-5)
    assert out.shape == (B, Cout, H, W)

    # bf16 streaming variant: bf16 MXU operands, f32 accumulation, bf16 output.
    out_bf16 = jax.block_until_ready(
        senet_forward(x, params, compute_dtype=jnp.bfloat16,
                      out_dtype=jnp.bfloat16))
    np.testing.assert_allclose(np.asarray(out_bf16.astype(jnp.float32)),
                               np.asarray(ref), rtol=5e-2, atol=5e-2)

    print("KERNEL_OK")
</pallas_src>

<mosaic_0001>
module attributes {stable_mosaic.version = 11 : i64} {
  func.func @_senet_kernel(%arg0: i32, %arg1: memref<1x4x256xf32, #tpu.memory_space<vmem>>, %arg2: memref<8x72xf32, #tpu.memory_space<vmem>>, %arg3: memref<8x1xf32, #tpu.memory_space<vmem>>, %arg4: memref<8x8xf32, #tpu.memory_space<vmem>>, %arg5: memref<8x1xf32, #tpu.memory_space<vmem>>, %arg6: memref<1x8x256xf32, #tpu.memory_space<vmem>>, %arg7: memref<8x384xf32, #tpu.memory_space<vmem>>, %arg8: memref<8x256xf32, #tpu.memory_space<vmem>>) attributes {dimension_semantics = [#tpu.dimension_semantics<parallel>], iteration_bounds = array<i64: 2>, scalar_prefetch = 0 : i64, scratch_operands = 2 : i64, tpu.core_type = #tpu.core_type<tc>, window_params = [{transform_indices = @transform_0, window_bounds = array<i64: 1, 4, 256>}, {pipeline_mode = #tpu.pipeline_mode<synchronous>, transform_indices = @transform_1, window_bounds = array<i64: 8, 72>}, {pipeline_mode = #tpu.pipeline_mode<synchronous>, transform_indices = @transform_2, window_bounds = array<i64: 8, 1>}, {pipeline_mode = #tpu.pipeline_mode<synchronous>, transform_indices = @transform_3, window_bounds = array<i64: 8, 8>}, {pipeline_mode = #tpu.pipeline_mode<synchronous>, transform_indices = @transform_4, window_bounds = array<i64: 8, 1>}, {transform_indices = @transform_5, window_bounds = array<i64: 1, 8, 256>}]} {
    %cst = arith.constant 0.000000e+00 : f32
    %0 = vector.broadcast %cst : f32 to vector<8x384xf32>
    %c0 = arith.constant 0 : index
    %c0_0 = arith.constant 0 : index
    %1 = vector.load %arg7[%c0, %c0_0] : memref<8x384xf32, #tpu.memory_space<vmem>>, vector<8x384xf32>
    tpu.vector_store %arg7[%c0, %c0_0], %0 {strides = array<i32>} : memref<8x384xf32, #tpu.memory_space<vmem>>, vector<8x384xf32>,
    %c0_1 = arith.constant 0 : index
    %c0_2 = arith.constant 0 : index
    %c0_3 = arith.constant 0 : index
    %2 = vector.load %arg1[%c0_1, %c0_2, %c0_3] : memref<1x4x256xf32, #tpu.memory_space<vmem>>, vector<1x4x16xf32>
    %3 = vector.shape_cast %2 : vector<1x4x16xf32> to vector<4x16xf32>
    %c0_4 = arith.constant 0 : index
    %c19 = arith.constant 19 : index
    %4 = vector.load %arg7[%c0_4, %c19] : memref<8x384xf32, #tpu.memory_space<vmem>>, vector<4x16xf32>
    tpu.vector_store %arg7[%c0_4, %c19], %3 {strides = array<i32>} : memref<8x384xf32, #tpu.memory_space<vmem>>, vector<4x16xf32>,
    %c0_5 = arith.constant 0 : index
    %c0_6 = arith.constant 0 : index
    %c16 = arith.constant 16 : index
    %5 = vector.load %arg1[%c0_5, %c0_6, %c16] : memref<1x4x256xf32, #tpu.memory_space<vmem>>, vector<1x4x16xf32>
    %6 = vector.shape_cast %5 : vector<1x4x16xf32> to vector<4x16xf32>
    %c0_7 = arith.constant 0 : index
    %c37 = arith.constant 37 : index
    %7 = vector.load %arg7[%c0_7, %c37] : memref<8x384xf32, #tpu.memory_space<vmem>>, vector<4x16xf32>
    tpu.vector_store %arg7[%c0_7, %c37], %6 {strides = array<i32>} : memref<8x384xf32, #tpu.memory_space<vmem>>, vector<4x16xf32>,
    %c0_8 = arith.constant 0 : index
    %c0_9 = arith.constant 0 : index
    %c32 = arith.constant 32 : index
    %8 = vector.load %arg1[%c0_8, %c0_9, %c32] : memref<1x4x256xf32, #tpu.memory_space<vmem>>, vector<1x4x16xf32>
    %9 = vector.shape_cast %8 : vector<1x4x16xf32> to vector<4x16xf32>
    %c0_10 = arith.constant 0 : index
    %c55 = arith.constant 55 : index
    %10 = vector.load %arg7[%c0_10, %c55] : memref<8x384xf32, #tpu.memory_space<vmem>>, vector<4x16xf32>
    tpu.vector_store %arg7[%c0_10, %c55], %9 {strides = array<i32>} : memref<8x384xf32, #tpu.memory_space<vmem>>, vector<4x16xf32>,
    %c0_11 = arith.constant 0 : index
    %c0_12 = arith.constant 0 : index
    %c48 = arith.constant 48 : index
    %11 = vector.load %arg1[%c0_11, %c0_12, %c48] : memref<1x4x256xf32, #tpu.memory_space<vmem>>, vector<1x4x16xf32>
    %12 = vector.shape_cast %11 : vector<1x4x16xf32> to vector<4x16xf32>
    %c0_13 = arith.constant 0 : index
    %c73 = arith.constant 73 : index
    %13 = vector.load %arg7[%c0_13, %c73] : memref<8x384xf32, #tpu.memory_space<vmem>>, vector<4x16xf32>
    tpu.vector_store %arg7[%c0_13, %c73], %12 {strides = array<i32>} : memref<8x384xf32, #tpu.memory_space<vmem>>, vector<4x16xf32>,
    %c0_14 = arith.constant 0 : index
    %c0_15 = arith.constant 0 : index
    %c64 = arith.constant 64 : index
    %14 = vector.load %arg1[%c0_14, %c0_15, %c64] : memref<1x4x256xf32, #tpu.memory_space<vmem>>, vector<1x4x16xf32>
    %15 = vector.shape_cast %14 : vector<1x4x16xf32> to vector<4x16xf32>
    %c0_16 = arith.constant 0 : index
    %c91 = arith.constant 91 : index
    %16 = vector.load %arg7[%c0_16, %c91] : memref<8x384xf32, #tpu.memory_space<vmem>>, vector<4x16xf32>
    tpu.vector_store %arg7[%c0_16, %c91], %15 {strides = array<i32>} : memref<8x384xf32, #tpu.memory_space<vmem>>, vector<4x16xf32>,
    %c0_17 = arith.constant 0 : index
    %c0_18 = arith.constant 0 : index
    %c80 = arith.constant 80 : index
    %17 = vector.load %arg1[%c0_17, %c0_18, %c80] : memref<1x4x256xf32, #tpu.memory_space<vmem>>, vector<1x4x16xf32>
    %18 = vector.shape_cast %17 : vector<1x4x16xf32> to vector<4x16xf32>
    %c0_19 = arith.constant 0 : index
    %c109 = arith.constant 109 : index
    %19 = vector.load %arg7[%c0_19, %c109] : memref<8x384xf32, #tpu.memory_space<vmem>>, vector<4x16xf32>
    tpu.vector_store %arg7[%c0_19, %c109], %18 {strides = array<i32>} : memref<8x384xf32, #tpu.memory_space<vmem>>, vector<4x16xf32>,
    %c0_20 = arith.constant 0 : index
    %c0_21 = arith.constant 0 : index
    %c96 = arith.constant 96 : index
    %20 = vector.load %arg1[%c0_20, %c0_21, %c96] : memref<1x4x256xf32, #tpu.memory_space<vmem>>, vector<1x4x16xf32>
    %21 = vector.shape_cast %20 : vector<1x4x16xf32> to vector<4x16xf32>
    %c0_22 = arith.constant 0 : index
    %c127 = arith.constant 127 : index
    %22 = vector.load %arg7[%c0_22, %c127] : memref<8x384xf32, #tpu.memory_space<vmem>>, vector<4x16xf32>
    tpu.vector_store %arg7[%c0_22, %c127], %21 {strides = array<i32>} : memref<8x384xf32, #tpu.memory_space<vmem>>, vector<4x16xf32>,
    %c0_23 = arith.constant 0 : index
    %c0_24 = arith.constant 0 : index
    %c112 = arith.constant 112 : index
    %23 = vector.load %arg1[%c0_23, %c0_24, %c112] : memref<1x4x256xf32, #tpu.memory_space<vmem>>, vector<1x4x16xf32>
    %24 = vector.shape_cast %23 : vector<1x4x16xf32> to vector<4x16xf32>
    %c0_25 = arith.constant 0 : index
    %c145 = arith.constant 145 : index
    %25 = vector.load %arg7[%c0_25, %c145] : memref<8x384xf32, #tpu.memory_space<vmem>>, vector<4x16xf32>
    tpu.vector_store %arg7[%c0_25, %c145], %24 {strides = array<i32>} : memref<8x384xf32, #tpu.memory_space<vmem>>, vector<4x16xf32>,
    %c0_26 = arith.constant 0 : index
    %c0_27 = arith.constant 0 : index
    %c128 = arith.constant 128 : index
    %26 = vector.load %arg1[%c0_26, %c0_27, %c128] : memref<1x4x256xf32, #tpu.memory_space<vmem>>, vector<1x4x16xf32>
    %27 = vector.shape_cast %26 : vector<1x4x16xf32> to vector<4x16xf32>
    %c0_28 = arith.constant 0 : index
    %c163 = arith.constant 163 : index
    %28 = vector.load %arg7[%c0_28, %c163] : memref<8x384xf32, #tpu.memory_space<vmem>>, vector<4x16xf32>
    tpu.vector_store %arg7[%c0_28, %c163], %27 {strides = array<i32>} : memref<8x384xf32, #tpu.memory_space<vmem>>, vector<4x16xf32>,
    %c0_29 = arith.constant 0 : index
    %c0_30 = arith.constant 0 : index
    %c144 = arith.constant 144 : index
    %29 = vector.load %arg1[%c0_29, %c0_30, %c144] : memref<1x4x256xf32, #tpu.memory_space<vmem>>, vector<1x4x16xf32>
    %30 = vector.shape_cast %29 : vector<1x4x16xf32> to vector<4x16xf32>
    %c0_31 = arith.constant 0 : index
    %c181 = arith.constant 181 : index
    %31 = vector.load %arg7[%c0_31, %c181] : memref<8x384xf32, #tpu.memory_space<vmem>>, vector<4x16xf32>
    tpu.vector_store %arg7[%c0_31, %c181], %30 {strides = array<i32>} : memref<8x384xf32, #tpu.memory_space<vmem>>, vector<4x16xf32>,
    %c0_32 = arith.constant 0 : index
    %c0_33 = arith.constant 0 : index
    %c160 = arith.constant 160 : index
    %32 = vector.load %arg1[%c0_32, %c0_33, %c160] : memref<1x4x256xf32, #tpu.memory_space<vmem>>, vector<1x4x16xf32>
    %33 = vector.shape_cast %32 : vector<1x4x16xf32> to vector<4x16xf32>
    %c0_34 = arith.constant 0 : index
    %c199 = arith.constant 199 : index
    %34 = vector.load %arg7[%c0_34, %c199] : memref<8x384xf32, #tpu.memory_space<vmem>>, vector<4x16xf32>
    tpu.vector_store %arg7[%c0_34, %c199], %33 {strides = array<i32>} : memref<8x384xf32, #tpu.memory_space<vmem>>, vector<4x16xf32>,
    %c0_35 = arith.constant 0 : index
    %c0_36 = arith.constant 0 : index
    %c176 = arith.constant 176 : index
    %35 = vector.load %arg1[%c0_35, %c0_36, %c176] : memref<1x4x256xf32, #tpu.memory_space<vmem>>, vector<1x4x16xf32>
    %36 = vector.shape_cast %35 : vector<1x4x16xf32> to vector<4x16xf32>
    %c0_37 = arith.constant 0 : index
    %c217 = arith.constant 217 : index
    %37 = vector.load %arg7[%c0_37, %c217] : memref<8x384xf32, #tpu.memory_space<vmem>>, vector<4x16xf32>
    tpu.vector_store %arg7[%c0_37, %c217], %36 {strides = array<i32>} : memref<8x384xf32, #tpu.memory_space<vmem>>, vector<4x16xf32>,
    %c0_38 = arith.constant 0 : index
    %c0_39 = arith.constant 0 : index
    %c192 = arith.constant 192 : index
    %38 = vector.load %arg1[%c0_38, %c0_39, %c192] : memref<1x4x256xf32, #tpu.memory_space<vmem>>, vector<1x4x16xf32>
    %39 = vector.shape_cast %38 : vector<1x4x16xf32> to vector<4x16xf32>
    %c0_40 = arith.constant 0 : index
    %c235 = arith.constant 235 : index
    %40 = vector.load %arg7[%c0_40, %c235] : memref<8x384xf32, #tpu.memory_space<vmem>>, vector<4x16xf32>
    tpu.vector_store %arg7[%c0_40, %c235], %39 {strides = array<i32>} : memref<8x384xf32, #tpu.memory_space<vmem>>, vector<4x16xf32>,
    %c0_41 = arith.constant 0 : index
    %c0_42 = arith.constant 0 : index
    %c208 = arith.constant 208 : index
    %41 = vector.load %arg1[%c0_41, %c0_42, %c208] : memref<1x4x256xf32, #tpu.memory_space<vmem>>, vector<1x4x16xf32>
    %42 = vector.shape_cast %41 : vector<1x4x16xf32> to vector<4x16xf32>
    %c0_43 = arith.constant 0 : index
    %c253 = arith.constant 253 : index
    %43 = vector.load %arg7[%c0_43, %c253] : memref<8x384xf32, #tpu.memory_space<vmem>>, vector<4x16xf32>
    tpu.vector_store %arg7[%c0_43, %c253], %42 {strides = array<i32>} : memref<8x384xf32, #tpu.memory_space<vmem>>, vector<4x16xf32>,
    %c0_44 = arith.constant 0 : index
    %c0_45 = arith.constant 0 : index
    %c224 = arith.constant 224 : index
    %44 = vector.load %arg1[%c0_44, %c0_45, %c224] : memref<1x4x256xf32, #tpu.memory_space<vmem>>, vector<1x4x16xf32>
    %45 = vector.shape_cast %44 : vector<1x4x16xf32> to vector<4x16xf32>
    %c0_46 = arith.constant 0 : index
    %c271 = arith.constant 271 : index
    %46 = vector.load %arg7[%c0_46, %c271] : memref<8x384xf32, #tpu.memory_space<vmem>>, vector<4x16xf32>
    tpu.vector_store %arg7[%c0_46, %c271], %45 {strides = array<i32>} : memref<8x384xf32, #tpu.memory_space<vmem>>, vector<4x16xf32>,
    %c0_47 = arith.constant 0 : index
    %c0_48 = arith.constant 0 : index
    %c240 = arith.constant 240 : index
    %47 = vector.load %arg1[%c0_47, %c0_48, %c240] : memref<1x4x256xf32, #tpu.memory_space<vmem>>, vector<1x4x16xf32>
    %48 = vector.shape_cast %47 : vector<1x4x16xf32> to vector<4x16xf32>
    %c0_49 = arith.constant 0 : index
    %c289 = arith.constant 289 : index
    %49 = vector.load %arg7[%c0_49, %c289] : memref<8x384xf32, #tpu.memory_space<vmem>>, vector<4x16xf32>
    tpu.vector_store %arg7[%c0_49, %c289], %48 {strides = array<i32>} : memref<8x384xf32, #tpu.memory_space<vmem>>, vector<4x16xf32>,
    %c0_50 = arith.constant 0 : index
    %c0_51 = arith.constant 0 : index
    %50 = vector.load %arg7[%c0_50, %c0_51] : memref<8x384xf32, #tpu.memory_space<vmem>>, vector<8x288xf32>
    %c0_52 = arith.constant 0 : index
    %c1 = arith.constant 1 : index
    %51 = vector.load %arg7[%c0_52, %c1] : memref<8x384xf32, #tpu.memory_space<vmem>>, vector<8x288xf32>
    %c0_53 = arith.constant 0 : index
    %c2 = arith.constant 2 : index
    %52 = vector.load %arg7[%c0_53, %c2] : memref<8x384xf32, #tpu.memory_space<vmem>>, vector<8x288xf32>
    %c0_54 = arith.constant 0 : index
    %c18 = arith.constant 18 : index
    %53 = vector.load %arg7[%c0_54, %c18] : memref<8x384xf32, #tpu.memory_space<vmem>>, vector<8x288xf32>
    %c0_55 = arith.constant 0 : index
    %c19_56 = arith.constant 19 : index
    %54 = vector.load %arg7[%c0_55, %c19_56] : memref<8x384xf32, #tpu.memory_space<vmem>>, vector<8x288xf32>
    %c0_57 = arith.constant 0 : index
    %c20 = arith.constant 20 : index
    %55 = vector.load %arg7[%c0_57, %c20] : memref<8x384xf32, #tpu.memory_space<vmem>>, vector<8x288xf32>
    %c0_58 = arith.constant 0 : index
    %c36 = arith.constant 36 : index
    %56 = vector.load %arg7[%c0_58, %c36] : memref<8x384xf32, #tpu.memory_space<vmem>>, vector<8x288xf32>
    %c0_59 = arith.constant 0 : index
    %c37_60 = arith.constant 37 : index
    %57 = vector.load %arg7[%c0_59, %c37_60] : memref<8x384xf32, #tpu.memory_space<vmem>>, vector<8x288xf32>
    %c0_61 = arith.constant 0 : index
    %c38 = arith.constant 38 : index
    %58 = vector.load %arg7[%c0_61, %c38] : memref<8x384xf32, #tpu.memory_space<vmem>>, vector<8x288xf32>
    %59 = tpu.concatenate %50, %51, %52, %53, %54, %55, %56, %57, %58 in 0 : vector<8x288xf32>, vector<8x288xf32>, vector<8x288xf32>, vector<8x288xf32>, vector<8x288xf32>, vector<8x288xf32>, vector<8x288xf32>, vector<8x288xf32>, vector<8x288xf32> -> vector<72x288xf32>
    %c0_62 = arith.constant 0 : index
    %c0_63 = arith.constant 0 : index
    %60 = vector.load %arg2[%c0_62, %c0_63] : memref<8x72xf32, #tpu.memory_space<vmem>>, vector<8x72xf32>
    %cst_64 = arith.constant dense<0.000000e+00> : vector<8x288xf32>
    %61 = tpu.matmul %60, %59, %cst_64 {dimension_numbers = #tpu.dot_dimension_numbers<[1], [0], [0], [1], [0, 0, 1, 1], [], []>} : vector<8x72xf32>, vector<72x288xf32>, vector<8x288xf32> -> vector<8x288xf32>
    %c0_65 = arith.constant 0 : index
    %c0_66 = arith.constant 0 : index
    %62 = vector.load %arg3[%c0_65, %c0_66] : memref<8x1xf32, #tpu.memory_space<vmem>>, vector<8x1xf32>
    %63 = vector.broadcast %62 : vector<8x1xf32> to vector<8x288xf32>
    %64 = arith.addf %61, %63 : vector<8x288xf32>
    %cst_67 = arith.constant 0.000000e+00 : f32
    %65 = vector.broadcast %cst_67 : f32 to vector<8x288xf32>
    %66 = arith.maximumf %64, %65 : vector<8x288xf32>
    %67 = vector.extract_strided_slice %66 {offsets = [0, 0], sizes = [8, 16], strides = [1, 1]} : vector<8x288xf32> to vector<8x16xf32>
    %c0_68 = arith.constant 0 : index
    %c0_69 = arith.constant 0 : index
    %68 = vector.load %arg8[%c0_68, %c0_69] : memref<8x256xf32, #tpu.memory_space<vmem>>, vector<8x16xf32>
    tpu.vector_store %arg8[%c0_68, %c0_69], %67 {strides = array<i32>} : memref<8x256xf32, #tpu.memory_space<vmem>>, vector<8x16xf32>,
    %69 = vector.extract_strided_slice %66 {offsets = [0, 18], sizes = [8, 16], strides = [1, 1]} : vector<8x288xf32> to vector<8x16xf32>
    %c0_70 = arith.constant 0 : index
    %c16_71 = arith.constant 16 : index
    %70 = vector.load %arg8[%c0_70, %c16_71] : memref<8x256xf32, #tpu.memory_space<vmem>>, vector<8x16xf32>
    tpu.vector_store %arg8[%c0_70, %c16_71], %69 {strides = array<i32>} : memref<8x256xf32, #tpu.memory_space<vmem>>, vector<8x16xf32>,
    %71 = vector.extract_strided_slice %66 {offsets = [0, 36], sizes = [8, 16], strides = [1, 1]} : vector<8x288xf32> to vector<8x16xf32>
    %c0_72 = arith.constant 0 : index
    %c32_73 = arith.constant 32 : index
    %72 = vector.load %arg8[%c0_72, %c32_73] : memref<8x256xf32, #tpu.memory_space<vmem>>, vector<8x16xf32>
    tpu.vector_store %arg8[%c0_72, %c32_73], %71 {strides = array<i32>} : memref<8x256xf32, #tpu.memory_space<vmem>>, vector<8x16xf32>,
    %73 = vector.extract_strided_slice %66 {offsets = [0, 54], sizes = [8, 16], strides = [1, 1]} : vector<8x288xf32> to vector<8x16xf32>
    %c0_74 = arith.constant 0 : index
    %c48_75 = arith.constant 48 : index
    %74 = vector.load %arg8[%c0_74, %c48_75] : memref<8x256xf32, #tpu.memory_space<vmem>>, vector<8x16xf32>
    tpu.vector_store %arg8[%c0_74, %c48_75], %73 {strides = array<i32>} : memref<8x256xf32, #tpu.memory_space<vmem>>, vector<8x16xf32>,
    %75 = vector.extract_strided_slice %66 {offsets = [0, 72], sizes = [8, 16], strides = [1, 1]} : vector<8x288xf32> to vector<8x16xf32>
    %c0_76 = arith.constant 0 : index
    %c64_77 = arith.constant 64 : index
    %76 = vector.load %arg8[%c0_76, %c64_77] : memref<8x256xf32, #tpu.memory_space<vmem>>, vector<8x16xf32>
    tpu.vector_store %arg8[%c0_76, %c64_77], %75 {strides = array<i32>} : memref<8x256xf32, #tpu.memory_space<vmem>>, vector<8x16xf32>,
    %77 = vector.extract_strided_slice %66 {offsets = [0, 90], sizes = [8, 16], strides = [1, 1]} : vector<8x288xf32> to vector<8x16xf32>
    %c0_78 = arith.constant 0 : index
    %c80_79 = arith.constant 80 : index
    %78 = vector.load %arg8[%c0_78, %c80_79] : memref<8x256xf32, #tpu.memory_space<vmem>>, vector<8x16xf32>
    tpu.vector_store %arg8[%c0_78, %c80_79], %77 {strides = array<i32>} : memref<8x256xf32, #tpu.memory_space<vmem>>, vector<8x16xf32>,
    %79 = vector.extract_strided_slice %66 {offsets = [0, 108], sizes = [8, 16], strides = [1, 1]} : vector<8x288xf32> to vector<8x16xf32>
    %c0_80 = arith.constant 0 : index
    %c96_81 = arith.constant 96 : index
    %80 = vector.load %arg8[%c0_80, %c96_81] : memref<8x256xf32, #tpu.memory_space<vmem>>, vector<8x16xf32>
    tpu.vector_store %arg8[%c0_80, %c96_81], %79 {strides = array<i32>} : memref<8x256xf32, #tpu.memory_space<vmem>>, vector<8x16xf32>,
    %81 = vector.extract_strided_slice %66 {offsets = [0, 126], sizes = [8, 16], strides = [1, 1]} : vector<8x288xf32> to vector<8x16xf32>
    %c0_82 = arith.constant 0 : index
    %c112_83 = arith.constant 112 : index
    %82 = vector.load %arg8[%c0_82, %c112_83] : memref<8x256xf32, #tpu.memory_space<vmem>>, vector<8x16xf32>
    tpu.vector_store %arg8[%c0_82, %c112_83], %81 {strides = array<i32>} : memref<8x256xf32, #tpu.memory_space<vmem>>, vector<8x16xf32>,
    %83 = vector.extract_strided_slice %66 {offsets = [0, 144], sizes = [8, 16], strides = [1, 1]} : vector<8x288xf32> to vector<8x16xf32>
    %c0_84 = arith.constant 0 : index
    %c128_85 = arith.constant 128 : index
    %84 = vector.load %arg8[%c0_84, %c128_85] : memref<8x256xf32, #tpu.memory_space<vmem>>, vector<8x16xf32>
    tpu.vector_store %arg8[%c0_84, %c128_85], %83 {strides = array<i32>} : memref<8x256xf32, #tpu.memory_space<vmem>>, vector<8x16xf32>,
    %85 = vector.extract_strided_slice %66 {offsets = [0, 162], sizes = [8, 16], strides = [1, 1]} : vector<8x288xf32> to vector<8x16xf32>
    %c0_86 = arith.constant 0 : index
    %c144_87 = arith.constant 144 : index
    %86 = vector.load %arg8[%c0_86, %c144_87] : memref<8x256xf32, #tpu.memory_space<vmem>>, vector<8x16xf32>
    tpu.vector_store %arg8[%c0_86, %c144_87], %85 {strides = array<i32>} : memref<8x256xf32, #tpu.memory_space<vmem>>, vector<8x16xf32>,
    %87 = vector.extract_strided_slice %66 {offsets = [0, 180], sizes = [8, 16], strides = [1, 1]} : vector<8x288xf32> to vector<8x16xf32>
    %c0_88 = arith.constant 0 : index
    %c160_89 = arith.constant 160 : index
    %88 = vector.load %arg8[%c0_88, %c160_89] : memref<8x256xf32, #tpu.memory_space<vmem>>, vector<8x16xf32>
    tpu.vector_store %arg8[%c0_88, %c160_89], %87 {strides = array<i32>} : memref<8x256xf32, #tpu.memory_space<vmem>>, vector<8x16xf32>,
    %89 = vector.extract_strided_slice %66 {offsets = [0, 198], sizes = [8, 16], strides = [1, 1]} : vector<8x288xf32> to vector<8x16xf32>
    %c0_90 = arith.constant 0 : index
    %c176_91 = arith.constant 176 : index
    %90 = vector.load %arg8[%c0_90, %c176_91] : memref<8x256xf32, #tpu.memory_space<vmem>>, vector<8x16xf32>
    tpu.vector_store %arg8[%c0_90, %c176_91], %89 {strides = array<i32>} : memref<8x256xf32, #tpu.memory_space<vmem>>, vector<8x16xf32>,
    %91 = vector.extract_strided_slice %66 {offsets = [0, 216], sizes = [8, 16], strides = [1, 1]} : vector<8x288xf32> to vector<8x16xf32>
    %c0_92 = arith.constant 0 : index
    %c192_93 = arith.constant 192 : index
    %92 = vector.load %arg8[%c0_92, %c192_93] : memref<8x256xf32, #tpu.memory_space<vmem>>, vector<8x16xf32>
    tpu.vector_store %arg8[%c0_92, %c192_93], %91 {strides = array<i32>} : memref<8x256xf32, #tpu.memory_space<vmem>>, vector<8x16xf32>,
    %93 = vector.extract_strided_slice %66 {offsets = [0, 234], sizes = [8, 16], strides = [1, 1]} : vector<8x288xf32> to vector<8x16xf32>
    %c0_94 = arith.constant 0 : index
    %c208_95 = arith.constant 208 : index
    %94 = vector.load %arg8[%c0_94, %c208_95] : memref<8x256xf32, #tpu.memory_space<vmem>>, vector<8x16xf32>
    tpu.vector_store %arg8[%c0_94, %c208_95], %93 {strides = array<i32>} : memref<8x256xf32, #tpu.memory_space<vmem>>, vector<8x16xf32>,
    %95 = vector.extract_strided_slice %66 {offsets = [0, 252], sizes = [8, 16], strides = [1, 1]} : vector<8x288xf32> to vector<8x16xf32>
    %c0_96 = arith.constant 0 : index
    %c224_97 = arith.constant 224 : index
    %96 = vector.load %arg8[%c0_96, %c224_97] : memref<8x256xf32, #tpu.memory_space<vmem>>, vector<8x16xf32>
    tpu.vector_store %arg8[%c0_96, %c224_97], %95 {strides = array<i32>} : memref<8x256xf32, #tpu.memory_space<vmem>>, vector<8x16xf32>,
    %97 = vector.extract_strided_slice %66 {offsets = [0, 270], sizes = [8, 16], strides = [1, 1]} : vector<8x288xf32> to vector<8x16xf32>
    %c0_98 = arith.constant 0 : index
    %c240_99 = arith.constant 240 : index
    %98 = vector.load %arg8[%c0_98, %c240_99] : memref<8x256xf32, #tpu.memory_space<vmem>>, vector<8x16xf32>
    tpu.vector_store %arg8[%c0_98, %c240_99], %97 {strides = array<i32>} : memref<8x256xf32, #tpu.memory_space<vmem>>, vector<8x16xf32>,
    %c0_100 = arith.constant 0 : index
    %c0_101 = arith.constant 0 : index
    %99 = vector.load %arg8[%c0_100, %c0_101] : memref<8x256xf32, #tpu.memory_space<vmem>>, vector<8x256xf32>
    %cst_102 = arith.constant dense<0.000000e+00> : vector<8xf32>
    %100 = vector.multi_reduction <add>, %99, %cst_102 [1] : vector<8x256xf32> to vector<8xf32>
    %101 = vector.shape_cast %100 : vector<8xf32> to vector<8x1xf32>
    %cst_103 = arith.constant 3.906250e-03 : f32
    %102 = vector.broadcast %cst_103 : f32 to vector<8x1xf32>
    %103 = arith.mulf %101, %102 : vector<8x1xf32>
    %c0_104 = arith.constant 0 : index
    %c0_105 = arith.constant 0 : index
    %104 = vector.load %arg4[%c0_104, %c0_105] : memref<8x8xf32, #tpu.memory_space<vmem>>, vector<8x8xf32>
    %cst_106 = arith.constant dense<0.000000e+00> : vector<8x1xf32>
    %105 = tpu.matmul %104, %103, %cst_106 {dimension_numbers = #tpu.dot_dimension_numbers<[1], [0], [0], [1], [0, 0, 1, 1], [], []>} : vector<8x8xf32>, vector<8x1xf32>, vector<8x1xf32> -> vector<8x1xf32>
    %c0_107 = arith.constant 0 : index
    %c0_108 = arith.constant 0 : index
    %106 = vector.load %arg5[%c0_107, %c0_108] : memref<8x1xf32, #tpu.memory_space<vmem>>, vector<8x1xf32>
    %107 = arith.addf %105, %106 : vector<8x1xf32>
    %108 = arith.negf %107 : vector<8x1xf32>
    %109 = math.exp %108 : vector<8x1xf32>
    %cst_109 = arith.constant 1.000000e+00 : f32
    %110 = vector.broadcast %cst_109 : f32 to vector<8x1xf32>
    %111 = arith.addf %110, %109 : vector<8x1xf32>
    %112 = arith.divf %110, %111 : vector<8x1xf32>
    %c0_110 = arith.constant 0 : index
    %c0_111 = arith.constant 0 : index
    %113 = vector.load %arg8[%c0_110, %c0_111] : memref<8x256xf32, #tpu.memory_space<vmem>>, vector<8x256xf32>
    %114 = vector.broadcast %112 : vector<8x1xf32> to vector<8x256xf32>
    %115 = arith.mulf %113, %114 : vector<8x256xf32>
    %c0_112 = arith.constant 0 : index
    %c0_113 = arith.constant 0 : index
    %c0_114 = arith.constant 0 : index
    %116 = vector.load %arg6[%c0_112, %c0_113, %c0_114] : memref<1x8x256xf32, #tpu.memory_space<vmem>>, vector<1x8x256xf32>
    %117 = vector.shape_cast %116 : vector<1x8x256xf32> to vector<8x256xf32>
    %118 = vector.shape_cast %115 : vector<8x256xf32> to vector<1x8x256xf32>
    tpu.vector_store %arg6[%c0_112, %c0_113, %c0_114], %118 {strides = array<i32>} : memref<1x8x256xf32, #tpu.memory_space<vmem>>, vector<1x8x256xf32>,
    return
  }
  func.func @transform_0(%arg0: i32) -> (i32, i32, i32) {
    %c0_i32 = arith.constant 0 : i32
    %c0_i32_0 = arith.constant 0 : i32
    %c0_i32_1 = arith.constant 0 : i32
    return %arg0, %c0_i32, %c0_i32_0 : i32, i32, i32
  }
  func.func @transform_1(%arg0: i32) -> (i32, i32) {
    %c0_i32 = arith.constant 0 : i32
    %c0_i32_0 = arith.constant 0 : i32
    %c0_i32_1 = arith.constant 0 : i32
    return %c0_i32, %c0_i32_0 : i32, i32
  }
  func.func @transform_2(%arg0: i32) -> (i32, i32) {
    %c0_i32 = arith.constant 0 : i32
    %c0_i32_0 = arith.constant 0 : i32
    %c0_i32_1 = arith.constant 0 : i32
    return %c0_i32, %c0_i32_0 : i32, i32
  }
  func.func @transform_3(%arg0: i32) -> (i32, i32) {
    %c0_i32 = arith.constant 0 : i32
    %c0_i32_0 = arith.constant 0 : i32
    %c0_i32_1 = arith.constant 0 : i32
    return %c0_i32, %c0_i32_0 : i32, i32
  }
  func.func @transform_4(%arg0: i32) -> (i32, i32) {
    %c0_i32 = arith.constant 0 : i32
    %c0_i32_0 = arith.constant 0 : i32
    %c0_i32_1 = arith.constant 0 : i32
    return %c0_i32, %c0_i32_0 : i32, i32
  }
  func.func @transform_5(%arg0: i32) -> (i32, i32, i32) {
    %c0_i32 = arith.constant 0 : i32
    %c0_i32_0 = arith.constant 0 : i32
    %c0_i32_1 = arith.constant 0 : i32
    return %arg0, %c0_i32, %c0_i32_0 : i32, i32, i32
  }
}

</mosaic_0001>

<bundles_post_ra>
// kernel: tpu_custom_call.1
= control target key start
LH: loop header
LB: loop body
LE: loop exit
PB: predicated region body
PF: predicated region fallthrough
CT: control target
= control target key end

     0   :  { %10 = vsyncpa [#allocation5], 0  ;;  %s1471_s0 = inlined_call_operand.vmem [shape: f32[2,4,256], index: 0, kind: input, shape index: {}]   ;;  %s1472_s1 = inlined_call_operand.hbm [shape: f32[8,72], index: 1, kind: input, shape index: {}]   ;;  %s1473_s2 = inlined_call_operand.vmem [shape: f32[8,1], index: 2, kind: input, shape index: {}]   ;;  %s1474_s3 = inlined_call_operand.vmem [shape: f32[8,8], index: 3, kind: input, shape index: {}]   ;;  %s1475_s4 = inlined_call_operand.vmem [shape: f32[8,1], index: 4, kind: input, shape index: {}]   ;;  %s1476_s5 = inlined_call_operand.hbm [shape: f32[2,8,256], index: 5, kind: output, shape index: {}]  }
   0x1   :  { %11 = vsyncpa [#allocation6], 0 }
   0x2   :  { %13 = vsyncpa [#allocation6 + $0x1], 0  ;;  %s1260_s18 = smov 0   ;;  %s1262_s19 = smov 0  }
   0x3   :  { %s1264_s20 = smov 0   ;;  %s1266_s21 = smov 0  }
   0x4 LB: > { %s1281_s22 = sadd.s32 4294967295, %s1186_s21   ;;  %s875_s23 = sadd.s32 4294967294, %s1186_s21   ;;  %s1186_s21 = sphi %s1266_s21, %s1492_s21   ;;  %s1182_s20 = sphi %s1264_s20, %s1491_s20   ;;  %s1178_s19 = sphi %s1262_s19, %s1490_s19   ;;  %s1174_s18 = sphi %s1260_s18, %s1489_s18  }
   0x5   : > { %s1285_s24 = sadd.s32 1, %s1186_s21   ;;  %s136_s25 = sadd.s32 1, %s1182_s20 }
   0x6   : > { %s133_s26 = ssub.s32 %s1186_s21, %s1285_s24  ;;  %p146_p0 = scmp.ne.s32.totalorder %s1182_s20, %s1178_s19 }
   0x7   : > { %p134_p1 = scmp.eq.s32.totalorder %s133_s26, 0  ;;  %p147_p2 = scmp.eq.s32.totalorder %s1281_s22, 1 }
   0x8   : > { %p152_p3 = scmp.ne.s32.totalorder %s1178_s19, %s1174_s18  ;;  %p153_p4 = scmp.eq.s32.totalorder %s875_s23, 1 }
   0x9   : > { %s1296_s27 = scalar_select %p134_p1, %s1182_s20, %s136_s25  }
   0xa   : > { %p1298_p5 = por %p147_p2, %p146_p0  ;;  %p1302_p6 = por %p153_p4, %p152_p3 }
   0xb   : > { %p876_p7 = scmp.ge.s32.totalorder %s1186_s21, 1  ;;  %p160_p8 = scmp.lt.s32.totalorder %s1186_s21, 3 }
   0xc   : > { %s1480_s28 = scalar_select %p1298_p5, 1, 0 }
   0xd   : > { %s1481_s29 = scalar_select %p1302_p6, 1, 0 }
   0xe   : > { %p1477_p9 = scmp.eq.s32.totalorder %s1281_s22, 0  ;;  %p1309_p10 = pnand %p876_p7, %p160_p8 }
   0xf   : > { %s1188_s6 = smov [#allocation4]   ;;  %s1092_s11 = scalar_lea.hbm %s1472_s1, 128 }
  0x10   : > { %s1482_s30 = scalar_select %p1309_p10, 1, 0 }
  0x11   : > { %s173_s7 = sshll.u32 %s1188_s6, 4  ;;  %p967_p11 = pneg %p1309_p10  ;;  %s174_s7 = int_to_ptr.vmem [resolvable:$true] %s173_s7 }
  0x12   : > { %p1093_p13 = scmp.ne.s32.totalorder %s1472_s1, %s1092_s11  ;;  %p1099_p3 = scmp.lt.u32.totalorder %s1092_s11, %s1472_s1 }
  0x13   : > { %p1317_p12 = pnand %p1477_p9, %p967_p11 }
  0x15   : > { %p1094_p0 = pneg %p1317_p12 }
  0x17   : > { %p1095_p1 = pnand %p1094_p0, %p1093_p13 }
  0x19   : > { %p1096_p2 = pneg %p1095_p1 }
  0x1b   : > { %p1101_p4 = pnand %p1099_p3, %p1096_p2 }
  0x1d   : > { %1104 = shalt.err (!%p1101_p4)
}
  0x1e   : > { %s1105_s16 = scalar_lea.vmem %s174_s7, 128  ;;  %p1113_p9 = scmp.lt.s32.totalorder %s174_s7, %s174_s7 }
  0x1f   : > { %p1106_p7 = scmp.ne.s32.totalorder %s174_s7, %s1105_s16  ;;  %p1114_p6 = scmp.lt.s32.totalorder %s1105_s16, %s1105_s16 }
  0x21   : > { %p1108_p8 = pnand %p1106_p7, %p1094_p0  ;;  %p1115_p5 = por %p1114_p6, %p1113_p9 }
  0x23   : > { %p1109_p11 = pneg %p1108_p8 }
  0x25   : > { %p1116_p10 = pnand %p1115_p5, %p1109_p11 }
  0x27   : > { %1119 = shalt.err (!%p1116_p10)
}
  0x28   : > { %970 = dma.hbm_to_vmem [thread:$0]  (!%p1317_p12), %s1472_s1, 128, %s174_s7, [#allocation5]  }
  0x29   : > { %p1484_p13 = scmp.ne.s32.totalorder %s1482_s30, 0 }
  0x2a   : > { %p1485_p1 = scmp.eq.s32.totalorder (!%p1484_p13), %s1281_s22, 0 }
  0x2b   : > { %203 = sbr.rel (%p1484_p13) target bundleno = 1261 (0x4ed), region = 40 }
  0x32   : > { %1165 = dma.done.wait (%p1485_p1), [#allocation5], 128   ;;  %p1486_p0 = pmov %p1485_p1 }
  0x33   : > { %p231_p6 = scmp.lt.s32.totalorder %s1281_s22, 1  ;;  %v1189_v0 = vmov 0.0   ;;  %s1190_s8 = smov 31   ;;  %vm288_vm0 = vcmask 117760   ;;  %vm244_vm1 = vcmask 281752   ;;  %vm295_vm2 = vcmask 265352  }
  0x34   : > { %1167 = vsyncadd (%p1486_p0), [#allocation5], 4294967168  ;;  %237 = vst [vmem:[#allocation2 + $0x8] sm:$0xff] %v1189_v0  ;;  %532 = vmatprep.mubr.f32.mxu0 %v1189_v0  ;;  %s1191_s9 = smov 19   ;;  %s1192_s10 = smov 33   ;;  %vm302_vm3 = vcmask 412952  }
  0x35   : > { %236 = vst [vmem:[#allocation2] sm:$0xff] %v1189_v0  ;;  %238 = vst [vmem:[#allocation2 + $0x10] sm:$0xff] %v1189_v0  ;;  %s232_s25 = scalar_select %p231_p6, %s1281_s22, 1  ;;  %vm251_vm4 = vcmask 429352   ;;  %vm309_vm5 = vcmask 560552   ;;  %vm258_vm6 = vcmask 576952  }
  0x36   : > { %s1193_s11 = smov 35   ;;  %s1194_s12 = smov 21   ;;  %vm316_vm7 = vcmask 708152   ;;  %vm265_vm8 = vcmask 724552   ;;  %vm323_vm9 = vcmask 855752   ;;  %vm339_vm10 = vcmask 101376  }
  0x37   : > { %s893_s26 = sshll.u32 %s232_s25, 3  ;;  %s1195_s13 = smov 37   ;;  %vm272_vm11 = vcmask 872152   ;;  %vm330_vm12 = vcmask 1003352   ;;  %vm346_vm13 = vcmask 248952   ;;  %vm337_vm14 = vcmask 1044456  }
  0x38   : > { %s1352_s7 = scalar_lea.vmem %s1471_s0, %s893_s26  ;;  %s1196_s14 = smov 23   ;;  %vm279_vm15 = vcmask 1019752   ;;  %v1208_v34 = vmov 0.0|0.0   ;;  %v1215_v38 = vmov 0   ;;  %v458_v39 = vld [vmem:[%s1473_s2] sm:$0xff] }
  0x39   : > { %v281_v1 = vld [vmem:[%s1352_s7] sm:$0xf]  ;;  %v297_v4 = vld [vmem:[%s1352_s7 + $0x4] sm:$0xf]  ;;  %s1197_s15 = smov 39   ;;  %s1198_s16 = smov 25   ;;  %949 = vmatprep.subr.bf16.mxu1 %v1208_v34  ;;  %1086 = vset.pattern.permute.xlu1 %v1215_v38 }
  0x3a   : > { %v239_v2 = vld [vmem:[%s1352_s7] sm:$0xf]  ;;  %283 = vrot.lane.b32.xlu0 %v281_v1, %s1190_s8  ;;  %v304_v6 = vld [vmem:[%s1352_s7 + $0x4] sm:$0xf]  ;;  %s1199_s17 = smov 41   ;;  %s1200_s23 = smov 45  }
  0x3b   : > { %241 = vrot.lane.b32.xlu1 %v239_v2, %s1191_s9  ;;  %v290_v3 = vld [vmem:[%s1352_s7] sm:$0xf]  ;;  %v311_v8 = vld [vmem:[%s1352_s7 + $0x4] sm:$0xf]  ;;  %s1201_s25 = smov 27   ;;  %s1202_s26 = smov 43   ;;  %1087 = vset.pattern.permute.xlu0 %v1215_v38 }
  0x3c   : > { %v246_v5 = vld [vmem:[%s1352_s7] sm:$0xf]  ;;  %v318_v10 = vld [vmem:[%s1352_s7 + $0x4] sm:$0xf]  ;;  %s1203_s30 = smov 47   ;;  %s1204_s6 = smov 29  }
  0x3d   : > { %v253_v7 = vld [vmem:[%s1352_s7] sm:$0xf]  ;;  %v332_v11 = vld [vmem:[%s1352_s7 + $0x4] sm:$0xf]  ;;  %s1205_s8 = smov 49   ;;  %s1207_s9 = smov 127  }
  0x3e   : > { %292 = vrot.lane.b32.xlu0 %v290_v3, %s1192_s10  ;;  %v260_v9 = vld [vmem:[%s1352_s7] sm:$0xf]  ;;  %v325_v13 = vld [vmem:[%s1352_s7 + $0x4] sm:$0xf]  ;;  %s1209_s10 = smov 109   ;;  %p1487_p9 = scmp.ne.s32.totalorder %s1480_s28, 0 }
  0x3f   : > { %299 = vrot.lane.b32.xlu1 %v297_v4, %s1193_s11  ;;  %v267_v12 = vld [vmem:[%s1352_s7] sm:$0xf]  ;;  %v341_v14 = vld [vmem:[%s1352_s7 + $0x4] sm:$0xf]  ;;  %s1210_s11 = smov 110  }
  0x40   : > { %v274_v15 = vld [vmem:[%s1352_s7] sm:$0xf]  ;;  %v348_v16 = vld [vmem:[%s1352_s7 + $0x4] sm:$0xf]  ;;  %s1206_s7 = smov 126  }
  0x42   : > { %248 = vrot.lane.b32.xlu0 %v246_v5, %s1194_s12  ;;  %s1211_s12 = smov 92  }
  0x43   : > { %306 = vrot.lane.b32.xlu1 %v304_v6, %s1195_s13  ;;  %s1212_s13 = smov 108  }
  0x46   : > { %255 = vrot.lane.b32.xlu0 %v253_v7, %s1196_s14  ;;  %s1213_s14 = smov 91  }
  0x47   : > { %313 = vrot.lane.b32.xlu1 %v311_v8, %s1197_s15  ;;  %s1216_s15 = smov 90  }
  0x4a   : > { %262 = vrot.lane.b32.xlu0 %v260_v9, %s1198_s16 }
  0x4b   : > { %320 = vrot.lane.b32.xlu1 %v318_v10, %s1199_s17 }
  0x4e   : > { %334 = vrot.lane.b32.xlu0 %v332_v11, %s1200_s23  ;;  %s1217_s23 = smov 100  }
  0x4f   : > { %269 = vrot.lane.b32.xlu1 %v267_v12, %s1201_s25  ;;  %s1218_s25 = smov 114  }
  0x52   : > { %327 = vrot.lane.b32.xlu0 %v325_v13, %s1202_s26  ;;  %s1219_s26 = smov 124  }
  0x53   : > { %343 = vrot.lane.b32.xlu1 %v341_v14, %s1203_s30  ;;  %s1220_s30 = smov 112  }
  0x56   : > { %276 = vrot.lane.b32.xlu0 %v274_v15, %s1204_s6  ;;  %s1221_s6 = smov 122  }
  0x57   : > { %350 = vrot.lane.b32.xlu1 %v348_v16, %s1205_s8  ;;  %s1222_s8 = smov 120  }
  0xac   : > { %v284_v17 = vpop.permute.xlu0 %283 }
  0xad   : > { %v242_v18 = vpop.permute.xlu1 %241  ;;  %289 = vst.msk [vmem:[#allocation2 + $0x8] sm:$0xf] %vm288_vm0, %v284_v17  ;;  %vm353_vm0 = vcmask 396552  }
  0xae   : > { %245 = vst.msk [vmem:[#allocation2] sm:$0xf] %vm244_vm1, %v242_v18  ;;  %vm286_vm1 = vcmask 1044472  }
  0xb0   : > { %v293_v19 = vpop.permute.xlu0 %292 }
  0xb1   : > { %v300_v20 = vpop.permute.xlu1 %299  ;;  %296 = vst.msk [vmem:[#allocation2 + $0x8] sm:$0xf] %vm295_vm2, %v293_v19  ;;  %vm1214_vm2 = vmmov 0  }
  0xb2   : > { %303 = vst.msk [vmem:[#allocation2 + $0x8] sm:$0xf] %vm302_vm3, %v300_v20  ;;  %925 = vmatprep.mubr.msk.f32.mxu1 %vm1214_vm2, %v1189_v0  ;;  %vm367_vm3 = vcmask 1039360  }
  0xb4   : > { %v249_v21 = vpop.permute.xlu0 %248 }
  0xb5   : > { %v307_v22 = vpop.permute.xlu1 %306  ;;  %252 = vst.msk [vmem:[#allocation2] sm:$0xf] %vm251_vm4, %v249_v21  ;;  %vm391_vm4 = vcmask 900096  }
  0xb6   : > { %310 = vst.msk [vmem:[#allocation2 + $0x8] sm:$0xf] %vm309_vm5, %v307_v22  ;;  %vm379_vm5 = vcmask 1031168  }
  0xb8   : > { %v256_v23 = vpop.permute.xlu0 %255 }
  0xb9   : > { %v314_v24 = vpop.permute.xlu1 %313  ;;  %259 = vst.msk [vmem:[#allocation2] sm:$0xf] %vm258_vm6, %v256_v23  ;;  %vm415_vm6 = vcmask 883712  }
  0xba   : > { %317 = vst.msk [vmem:[#allocation2 + $0x8] sm:$0xf] %vm316_vm7, %v314_v24  ;;  %vm403_vm7 = vcmask 891904  }
  0xbc   : > { %v263_v25 = vpop.permute.xlu0 %262 }
  0xbd   : > { %v321_v26 = vpop.permute.xlu1 %320  ;;  %266 = vst.msk [vmem:[#allocation2] sm:$0xf] %vm265_vm8, %v263_v25  ;;  %vm439_vm8 = vcmask 744448  }
  0xbe   : > { %324 = vst.msk [vmem:[#allocation2 + $0x8] sm:$0xf] %vm323_vm9, %v321_v26  ;;  %vm427_vm9 = vcmask 752640  }
  0xc0   : > { %v335_v27 = vpop.permute.xlu0 %334 }
  0xc1   : > { %v270_v28 = vpop.permute.xlu1 %269  ;;  %340 = vst.msk [vmem:[#allocation2 + $0x10] sm:$0xf] %vm339_vm10, %v335_v27  ;;  %vm451_vm10 = vcmask 736256  }
  0xc2   : > { %273 = vst.msk [vmem:[#allocation2] sm:$0xf] %vm272_vm11, %v270_v28  ;;  %vm464_vm11 = vcmask 588800  }
  0xc4   : > { %v328_v29 = vpop.permute.xlu0 %327 }
  0xc5   : > { %v344_v30 = vpop.permute.xlu1 %343  ;;  %331 = vst.msk [vmem:[#allocation2 + $0x8] sm:$0xf] %vm330_vm12, %v328_v29  ;;  %vm612_vm12 = vcmask 130048  }
  0xc6   : > { %347 = vst.msk [vmem:[#allocation2 + $0x10] sm:$0xf] %vm346_vm13, %v344_v30  ;;  %vm618_vm13 = vcmask 261248  }
  0xc7   : > { %338 = vst.msk [vmem:[#allocation2 + $0x8] sm:$0xf] %vm337_vm14, %v335_v27  ;;  %vm623_vm14 = vcmask 392448  }
  0xc8   : > { %v277_v31 = vpop.permute.xlu0 %276 }
  0xc9   : > { %v351_v32 = vpop.permute.xlu1 %350  ;;  %280 = vst.msk [vmem:[#allocation2] sm:$0xf] %vm279_vm15, %v277_v31  ;;  %vm628_vm15 = vcmask 523648  }
  0xca   : > { %354 = vst.msk [vmem:[#allocation2 + $0x10] sm:$0xf] %vm353_vm0, %v351_v32  ;;  %vm633_vm0 = vcmask 654848  }
  0xcb   : > { %287 = vst.msk [vmem:[#allocation2] sm:$0xf] %vm286_vm1, %v284_v17  ;;  %vm638_vm1 = vcmask 786048  }
  0xce   : > { %v356_v36 = vld [vmem:[#allocation2 + $0x8] sm:$0xff] }
  0xd1   : > { %v357_v35 = vld [vmem:[#allocation2 + $0x10] sm:$0xff] }
  0xd2   : > { %v1370_v33 = vld [vmem:[#allocation2] sm:$0xff]  ;;  %v1051_v37 = vpack.i.bf16 %v357_v35, %v356_v36 }
  0xd3   : > { %373 = vrot.lane.b32.xlu0 %v1370_v33, %s1206_s7  ;;  %361 = vrot.lane.b32.xlu1 %v1370_v33, %s1207_s9 }
  0xd7   : > { %397 = vrot.lane.b32.xlu0 %v1370_v33, %s1209_s10  ;;  %385 = vrot.lane.b32.xlu1 %v1370_v33, %s1210_s11 }
  0xdb   : > { %421 = vrot.lane.b32.xlu0 %v1370_v33, %s1211_s12  ;;  %409 = vrot.lane.b32.xlu1 %v1370_v33, %s1212_s13 }
  0xdf   : > { %1052 = vrot.lane.b32.xlu0 %v1051_v37, %s1207_s9  ;;  %1062 = vrot.lane.b32.xlu1 %v1051_v37, %s1210_s11  ;;  %s1223_s9 = smov 118  }
  0xe3   : > { %1057 = vrot.lane.b32.xlu0 %v1051_v37, %s1206_s7  ;;  %1072 = vrot.lane.b32.xlu1 %v1051_v37, %s1212_s13 }
  0xe7   : > { %1067 = vrot.lane.b32.xlu0 %v1051_v37, %s1209_s10  ;;  %1082 = vrot.lane.b32.xlu1 %v1051_v37, %s1213_s14  ;;  %s1225_s10 = smov 116  }
  0xeb   : > { %1077 = vrot.lane.b32.xlu0 %v1051_v37, %s1211_s12  ;;  %433 = vrot.lane.b32.xlu1 %v1370_v33, %s1213_s14  ;;  %s1226_s12 = smov 104   ;;  %s1227_s14 = smov 102  }
  0xef   : > { %447 = vrot.lane.b32.xlu0 %v356_v36, %s1216_s15  ;;  %449 = vrot.lane.b32.xlu1 %v357_v35, %s1216_s15 }
  0xf3   : > { %445 = vrot.lane.b32.xlu0 %v1370_v33, %s1216_s15  ;;  %461 = vperm.xlu1 %1086, %v458_v39   ;;  %s1228_s15 = smov 98  }
 0x145   : > { %v374_v40 = vpop.permute.xlu0 %373  ;;  %v362_v41 = vpop.permute.xlu1 %361 }
 0x149   : > { %v398_v42 = vpop.permute.xlu0 %397  ;;  %v386_v43 = vpop.permute.xlu1 %385 }
 0x14d   : > { %v1392_v44 = vpop.permute.xlu0 %421  ;;  %v410_v45 = vpop.permute.xlu1 %409 }
 0x151   : > { %v1053_v46 = vpop.permute.xlu0 %1052  ;;  %v1063_v47 = vpop.permute.xlu1 %1062 }
 0x152   : > { %v1055_v48 = vunpack.i.h.bf16 %v1053_v46  ;;  %v1054_v49 = vunpack.i.l.bf16 %v1053_v46  ;;  %v1065_v50 = vunpack.i.h.bf16 %v1063_v47  ;;  %v1064_v51 = vunpack.i.l.bf16 %v1063_v47 }
 0x154   : > { %v950_v52 = vpack.c.bf16 %v1055_v48, %v357_v35  ;;  %v369_v53 = vsel %vm367_vm3, %v1054_v49, %v1055_v48  ;;  %v368_v54 = vsel %vm367_vm3, %v362_v41, %v1054_v49  ;;  %v393_v63 = vsel %vm391_vm4, %v1064_v51, %v1065_v50 }
 0x155   : > { %v1058_v55 = vpop.permute.xlu0 %1057  ;;  %v1073_v56 = vpop.permute.xlu1 %1072  ;;  %v933_v57 = vpack.c.bf16 %v369_v53, %v356_v36  ;;  %v935_v58 = vpack.c.bf16 %v368_v54, %v1370_v33  ;;  %v392_v4 = vsel %vm391_vm4, %v386_v43, %v1064_v51  ;;  %vm684_vm3 = vcmask 818176  }
 0x156   : > { %v1060_v59 = vunpack.i.h.bf16 %v1058_v55  ;;  %v1059_v60 = vunpack.i.l.bf16 %v1058_v55  ;;  %951 = vmatpush3.bf16.msra.mxu1 %v950_v52  ;;  %v1075_v61 = vunpack.i.h.bf16 %v1073_v56  ;;  %v1074_v62 = vunpack.i.l.bf16 %v1073_v56 }
 0x157   : > { %934 = vmatprep.subr.bf16.mxu0 %v933_v57  ;;  %952 = vmatprep.subr.bf16.mxu1 %v1208_v34  ;;  %vm650_vm4 = vcmask 932864  }
 0x158   : > { %v953_v1 = vpack.c.bf16 %v1065_v50, %v1060_v59  ;;  %936 = vmatpush1.bf16.msra.mxu0 %v935_v58  ;;  %v381_v2 = vsel %vm379_vm5, %v1059_v60, %v1060_v59  ;;  %v380_v3 = vsel %vm379_vm5, %v374_v40, %v1059_v60  ;;  %v417_v13 = vsel %vm415_vm6, %v1074_v62, %v1075_v61 }
 0x159   : > { %v1068_v5 = vpop.permute.xlu0 %1067  ;;  %v1083_v6 = vpop.permute.xlu1 %1082  ;;  %v937_v7 = vpack.c.bf16 %v393_v63, %v381_v2  ;;  %v939_v8 = vpack.c.bf16 %v392_v4, %v380_v3  ;;  %v416_v17 = vsel %vm415_vm6, %v410_v45, %v1074_v62  ;;  %vm653_vm5 = vcmask 1048448  }
 0x15a   : > { %v1070_v9 = vunpack.i.h.bf16 %v1068_v5  ;;  %v1069_v10 = vunpack.i.l.bf16 %v1068_v5  ;;  %954 = vmatpush3.bf16.msra.mxu1 %v953_v1  ;;  %v1085_v11 = vunpack.i.h.bf16 %v1083_v6  ;;  %v1084_v12 = vunpack.i.l.bf16 %v1083_v6 }
 0x15b   : > { %938 = vmatprep.subr.bf16.mxu0 %v937_v7  ;;  %955 = vmatprep.subr.bf16.mxu1 %v1208_v34  ;;  %vm700_vm6 = vcmask 64512  }
 0x15c   : > { %v956_v14 = vpack.c.bf16 %v1075_v61, %v1070_v9  ;;  %940 = vmatpush1.bf16.msra.mxu0 %v939_v8  ;;  %v405_v15 = vsel %vm403_vm7, %v1069_v10, %v1070_v9  ;;  %v404_v16 = vsel %vm403_vm7, %v398_v42, %v1069_v10  ;;  %v441_v24 = vsel %vm439_vm8, %v1084_v12, %v1085_v11  ;;  %v698_v8 = vld [vmem:[%s1474_s3] sm:$0xff] }
 0x15d   : > { %v1078_v18 = vpop.permute.xlu0 %1077  ;;  %v434_v19 = vpop.permute.xlu1 %433  ;;  %v941_v20 = vpack.c.bf16 %v417_v13, %v405_v15  ;;  %v943_v21 = vpack.c.bf16 %v416_v17, %v404_v16  ;;  %v699_v9 = vld [vmem:[%s1475_s4] sm:$0xff] }
 0x15e   : > { %v1080_v22 = vunpack.i.h.bf16 %v1078_v18  ;;  %v1079_v23 = vunpack.i.l.bf16 %v1078_v18  ;;  %957 = vmatpush3.bf16.msra.mxu1 %v956_v14  ;;  %v440_v27 = vsel %vm439_vm8, %v434_v19, %v1084_v12 }
 0x15f   : > { %942 = vmatprep.subr.bf16.mxu0 %v941_v20  ;;  %958 = vmatprep.subr.bf16.mxu1 %v1208_v34  ;;  %v457_v34 = vld [vmem:[#allocation4] sm:$0xff] }
 0x160   : > { %v959_v25 = vpack.c.bf16 %v1085_v11, %v1080_v22  ;;  %v428_v26 = vsel %vm427_vm9, %v1392_v44, %v1079_v23  ;;  %944 = vmatpush1.bf16.msra.mxu0 %v943_v21  ;;  %v429_v28 = vsel %vm427_vm9, %v1079_v23, %v1080_v22 }
 0x161   : > { %v947_v29 = vpack.c.bf16 %v440_v27, %v428_v26  ;;  %v448_v30 = vpop.permute.xlu0 %447  ;;  %v450_v31 = vpop.permute.xlu1 %449  ;;  %v945_v32 = vpack.c.bf16 %v441_v24, %v429_v28 }
 0x162   : > { %960 = vmatpush3.bf16.msra.mxu1 %v959_v25  ;;  %v453_v33 = vsel %vm451_vm10, %v448_v30, %v450_v31 }
 0x163   : > { %946 = vmatprep.subr.bf16.mxu0 %v945_v32  ;;  %923 = vmatprep.subr.mxu1 %v1189_v0 }
 0x164   : > { %948 = vmatpush1.bf16.msra.mxu0 %v947_v29 }
 0x165   : > { %v446_v35 = vpop.permute.xlu0 %445  ;;  %484 = vmatprep.subr.mxu0 %v453_v33 }
 0x166   : > { %924 = vmatpush3.msra.mxu1 %v450_v31  ;;  %v452_v36 = vsel %vm451_vm10, %v446_v35, %v448_v30 }
 0x167   : > { %926 = vmatmul.mubr.msk.f32.vlgmr.msra.gmra.mrb[0].mxu1 %vm464_vm11, %v457_v34 }
 0x168   : > { %485 = vmatpush1.msra.mxu0 %v452_v36 }
 0x169   : > { %884 = vmatmul.mubr.msk.f32.vlgmr.msra.gmra.mrb[0].mxu0 %vm464_vm11, %v457_v34  ;;  %928 = vmatprep.subr.mxu0 %v1189_v0 }
 0x16a   : > { %930 = vmatprep.mubr.msk.f32.mxu0 %vm1214_vm2, %v1189_v0  ;;  %vm643_vm2 = vcmask 917248  }
 0x172   : > { %v462_v37 = vpop.permute.xlu1 %461 }
 0x23a   : > { %v605_v38 = vpop.f32.mrb[0].mxu1 }
 0x23b   : > { %v606_v39 = vadd.f32 %v605_v38, %v462_v37  ;;  %v927_v40 = vpop.f32.mrb[1].mxu1 }
 0x23c   : > { %v534_v41 = vpop.f32.mrb[0].mxu0 }
 0x23d   : > { %v611_v42 = vmax.f32 %v606_v39, 0.0  ;;  %v535_v43 = vadd.f32 %v534_v41, %v462_v37  ;;  %v536_v44 = vpop.f32.mrb[1].mxu0 }
 0x23e   : > { %v537_v46 = vadd.f32 %v536_v44, %v462_v37 }
 0x23f   : > { %v609_v45 = vmax.f32 %v535_v43, 0.0  ;;  %682 = vrot.lane.b32.xlu0 %v611_v42, %s1217_s23 }
 0x240   : > { %v610_v0 = vmax.f32 %v537_v46, 0.0 }
 0x241   : > { %615 = vrot.lane.b32.xlu1 %v609_v45, %s1206_s7  ;;  %613 = vst.msk [vmem:[#allocation3] sm:$0xff] %vm612_vm12, %v609_v45  ;;  %s1224_s7 = smov 106  }
 0x243   : > { %646 = vrot.lane.b32.xlu0 %v609_v45, %s1218_s25 }
 0x245   : > { %620 = vrot.lane.b32.xlu1 %v609_v45, %s1219_s26  ;;  %s894_s26 = sshll.u32 %s1281_s22, 8  ;;  %s1229_s22 = smov [#allocation7]  }
 0x247   : > { %655 = vrot.lane.b32.xlu0 %v610_v0, %s1220_s30 }
 0x249   : > { %625 = vrot.lane.b32.xlu1 %v609_v45, %s1221_s6 }
 0x24b   : > { %659 = vrot.lane.b32.xlu0 %v610_v0, %s1210_s11 }
 0x24d   : > { %630 = vrot.lane.b32.xlu1 %v609_v45, %s1222_s8 }
 0x24f   : > { %663 = vrot.lane.b32.xlu0 %v610_v0, %s1212_s13 }
 0x251   : > { %635 = vrot.lane.b32.xlu1 %v609_v45, %s1223_s9 }
 0x253   : > { %667 = vrot.lane.b32.xlu0 %v610_v0, %s1224_s7  ;;  %s1429_s7 = scalar_lea.hbm %s1476_s5, %s894_s26 }
 0x255   : > { %640 = vrot.lane.b32.xlu1 %v609_v45, %s1225_s10 }
 0x257   : > { %671 = vrot.lane.b32.xlu0 %v610_v0, %s1226_s12 }
 0x259   : > { %680 = vrot.lane.b32.xlu1 %v610_v0, %s1217_s23  ;;  %s228_s23 = sand.u32 1, %s1178_s19  }
 0x25a   : > { %s790_s10 = scalar_lea.sflag [#allocation6], %s228_s23 }
 0x25b   : > { %675 = vrot.lane.b32.xlu0 %v610_v0, %s1227_s14  ;;  %s1124_s14 = sshll.u32 %s1229_s22, 4  ;;  %s1125_s14 = int_to_ptr.vmem [resolvable:$false] %s1124_s14 }
 0x25d   : > { %648 = vrot.lane.b32.xlu1 %v610_v0, %s1218_s25  ;;  %s881_s25 = sshll.u32 %s228_s23, 4 }
 0x25e   : > { %s230_s30 = scalar_lea.vmem [#allocation7], %s881_s25 }
 0x25f   : > { %688 = vrot.lane.b32.xlu0 %v611_v42, %s1228_s15  ;;  %s804_s6 = sshll.u32 %s230_s30, 4  ;;  %s1126_s15 = scalar_lea.vmem %s1125_s14, 512  ;;  %s1431_s6 = int_to_ptr.vmem [resolvable:$true] %s804_s6 }
 0x260   : > { %s1120_s12 = scalar_lea.vmem %s1431_s6, 256  ;;  %p1127_p2 = scmp.lt.s32.totalorder %s1431_s6, %s1125_s14 }
 0x261   : > { %p1121_p5 = scmp.ne.s32.totalorder %s1431_s6, %s1120_s12  ;;  %p1128_p3 = scmp.lt.s32.totalorder %s1126_s15, %s1120_s12 }
 0x263   : > { %p1122_p10 = pnand %p1121_p5, %p1487_p9  ;;  %p1129_p4 = por %p1128_p3, %p1127_p2 }
 0x265   : > { %p1123_p12 = pneg %p1122_p10 }
 0x267   : > { %p1130_p7 = pnand %p1129_p4, %p1123_p12 }
 0x2b1   : > { %v683_v47 = vpop.permute.xlu0 %682 }
 0x2b3   : > { %v616_v48 = vpop.permute.xlu1 %615 }
 0x2b4   : > { %619 = vst.msk [vmem:[#allocation3] sm:$0xff] %vm618_vm13, %v616_v48 }
 0x2b5   : > { %v647_v49 = vpop.permute.xlu0 %646 }
 0x2b7   : > { %v621_v50 = vpop.permute.xlu1 %620 }
 0x2b8   : > { %624 = vst.msk [vmem:[#allocation3] sm:$0xff] %vm623_vm14, %v621_v50 }
 0x2b9   : > { %v656_v51 = vpop.permute.xlu0 %655 }
 0x2ba   : > { %658 = vst.msk [vmem:[#allocation3 + $0x8] sm:$0xff] %vm612_vm12, %v656_v51 }
 0x2bb   : > { %v626_v52 = vpop.permute.xlu1 %625 }
 0x2bc   : > { %629 = vst.msk [vmem:[#allocation3] sm:$0xff] %vm628_vm15, %v626_v52 }
 0x2bd   : > { %v660_v53 = vpop.permute.xlu0 %659 }
 0x2be   : > { %662 = vst.msk [vmem:[#allocation3 + $0x8] sm:$0xff] %vm618_vm13, %v660_v53 }
 0x2bf   : > { %v631_v54 = vpop.permute.xlu1 %630 }
 0x2c0   : > { %634 = vst.msk [vmem:[#allocation3] sm:$0xff] %vm633_vm0, %v631_v54 }
 0x2c1   : > { %v664_v55 = vpop.permute.xlu0 %663 }
 0x2c2   : > { %666 = vst.msk [vmem:[#allocation3 + $0x8] sm:$0xff] %vm623_vm14, %v664_v55 }
 0x2c3   : > { %v636_v56 = vpop.permute.xlu1 %635 }
 0x2c4   : > { %639 = vst.msk [vmem:[#allocation3] sm:$0xff] %vm638_vm1, %v636_v56 }
 0x2c5   : > { %v668_v57 = vpop.permute.xlu0 %667 }
 0x2c6   : > { %670 = vst.msk [vmem:[#allocation3 + $0x8] sm:$0xff] %vm628_vm15, %v668_v57 }
 0x2c7   : > { %v641_v58 = vpop.permute.xlu1 %640 }
 0x2c8   : > { %644 = vst.msk [vmem:[#allocation3] sm:$0xff] %vm643_vm2, %v641_v58 }
 0x2c9   : > { %v672_v59 = vpop.permute.xlu0 %671 }
 0x2ca   : > { %674 = vst.msk [vmem:[#allocation3 + $0x8] sm:$0xff] %vm633_vm0, %v672_v59 }
 0x2cb   : > { %v681_v60 = vpop.permute.xlu1 %680 }
 0x2cc   : > { %v685_v62 = vsel %vm684_vm3, %v681_v60, %v683_v47 }
 0x2cd   : > { %v676_v61 = vpop.permute.xlu0 %675 }
 0x2ce   : > { %678 = vst.msk [vmem:[#allocation3 + $0x8] sm:$0xff] %vm638_vm1, %v676_v61 }
 0x2cf   : > { %687 = vst.msk [vmem:[#allocation3 + $0x8] sm:$0xff] %vm643_vm2, %v685_v62  ;;  %v649_v63 = vpop.permute.xlu1 %648 }
 0x2d0   : > { %v651_v1 = vsel %vm650_vm4, %v647_v49, %v649_v63 }
 0x2d1   : > { %654 = vst.msk [vmem:[#allocation3] sm:$0xff] %vm653_vm5, %v651_v1  ;;  %v689_v2 = vpop.permute.xlu0 %688 }
 0x2d2   : > { %691 = vst.msk [vmem:[#allocation3 + $0x8] sm:$0xff] %vm653_vm5, %v689_v2 }
 0x2d8   : > { %v692_v3 = vld [vmem:[#allocation3] sm:$0xff] }
 0x2d9   : > { %v693_v4 = vld [vmem:[#allocation3 + $0x8] sm:$0xff] }
 0x2da   : > { %v694_v5 = vadd.f32 %v693_v4, %v692_v3 }
 0x2dc   : > { %695 = vadd.xlane.f32.xlu1 %v694_v5 }
 0x369   : > { %v696_v6 = vpop.xlane.xlu1 %695 }
 0x36a   : > { %v697_v7 = vmul.f32 0.00390625, %v696_v6 }
 0x36c   : > { %929 = vmatpush3.msra.mxu0 %v697_v7 }
 0x36d   : > { %931 = vmatmul.mubr.msk.f32.vlgmr.msra.gmra.mrb[2].mxu0 %vm700_vm6, %v698_v8 }
 0x440   : > { %v770_v10 = vpop.f32.mrb[2].mxu0 }
 0x441   : > { %v771_v11 = vadd.f32 %v770_v10, %v699_v9  ;;  %v932_v12 = vpop.f32.mrb[3].mxu0 }
 0x443   : > { %v887_v13 = vmul.f32 -1.442695, %v771_v11 }
 0x445   : > { %1088 = vpow2.f32 %v887_v13 }
 0x44f   : > { %v1089_v14 = vpop.eup %1088 }
 0x450   : > { %v777_v15 = vadd.f32 1.0, %v1089_v14 }
 0x452   : > { %1090 = vrcp.f32 %v777_v15 }
 0x45c   : > { %v1091_v16 = vpop.eup %1090 }
 0x45d   : > { %782 = vperm.xlu0 %1087, %v1091_v16  }
 0x4dc   : > { %v783_v17 = vpop.permute.xlu0 %782 }
 0x4dd   : > { %v785_v18 = vmul.f32 %v783_v17, %v692_v3  ;;  %v786_v19 = vmul.f32 %v783_v17, %v693_v4 }
 0x4df   : > { %787 = vst [vmem:[%s230_s30] sm:$0xff] %v785_v18  ;;  %788 = vst [vmem:[%s230_s30 + $0x8] sm:$0xff] %v786_v19 }
 0x4e0   : > { %1133 = shalt.err (!%p1130_p7)
}
 0x4e1   : > { %s1134_s11 = scalar_lea.hbm %s1429_s7, 256  ;;  %s1138_s17 = scalar_lea.hbm %s1476_s5, 512 }
 0x4e2   : > { %p1135_p8 = scmp.ne.s32.totalorder %s1429_s7, %s1134_s11  ;;  %p1139_p1 = scmp.lt.u32.totalorder %s1429_s7, %s1476_s5 }
 0x4e3   : > { %p1140_p0 = scmp.lt.u32.totalorder %s1138_s17, %s1134_s11  ;;  %p1142_p5 = scmp.lt.u32.totalorder %s1134_s11, %s1429_s7 }
 0x4e4   : > { %p1136_p11 = pnand %p1135_p8, %p1487_p9 }
 0x4e5   : > { %p1141_p6 = por %p1140_p0, %p1139_p1 }
 0x4e6   : > { %p1137_p13 = pneg %p1136_p11 }
 0x4e7   : > { %p1143_p10 = por %p1142_p5, %p1141_p6 }
 0x4e9   : > { %p1144_p12 = pnand %p1143_p10, %p1137_p13 }
 0x4eb   : > { %1147 = shalt.err (!%p1144_p12)
}
 0x4ec   : > { %965 = dma.vmem_to_hbm [thread:$0]  (%p1487_p9), %s1431_s6, 256, %s1429_s7, %s790_s10  }
 0x4ed PF: > { %p977_p2 = scmp.ge.s32.totalorder %s1186_s21, 2  ;;  %s816_s26 = sand.u32 1, %s1174_s18  }
 0x4ee   : > { %p1488_p3 = scmp.ne.s32.totalorder %s1481_s29, 0  ;;  %s817_s30 = scalar_lea.sflag [#allocation6], %s816_s26 }
 0x4f0   : > { %p972_p4 = pnand %p977_p2, %p1488_p3 }
 0x4f2   : > { %1169 = dma.done.wait (!%p972_p4), %s817_s30, 256  }
 0x4f3   : > { %1171 = vsyncadd (!%p972_p4), %s817_s30, 4294967040  ;;  %p16_p7 = scmp.ge.s32.totalorder %s1285_s24, 4   ;;  %s1489_s18 = smov %s1178_s19 }
 0x4f4   : > { %s1490_s19 = smov %s1182_s20  ;;  %s1491_s20 = smov %s1296_s27 }
 0x4f5   : > { %s1492_s21 = smov %s1285_s24  ;;  %18 = sbr.rel (!%p16_p7) target bundleno = 4 (0x4), region = 80 }
 0x4fc   :  { %822 = vsyncpa [#allocation5], 1 }
 0x4fd   :  { %824 = vsyncpa [#allocation5 + $0x1], 1 }
 0x4fe   :  { %825 = vsyncpa [#allocation6], 1 }
 0x4ff   :  { %827 = vsyncpa [#allocation6 + $0x1], 1 }

</bundles_post_ra>
